<compile_context>
chip_gen: v7x
topology: tpu7x:2x2x1
jax: 0.10.0
libtpu: 0.0.40
codegen_flags: <defaults>
</compile_context>

<pallas_src>
import functools

import jax
import jax.numpy as jnp
import numpy as np
from jax import lax
from jax.experimental import pallas as pl
from jax.experimental.pallas import tpu as pltpu


def _round_up(x, m):
    return ((x + m - 1) // m) * m


# ---------------------------------------------------------------------------
# Kernel
# ---------------------------------------------------------------------------
def _actor_critic_kernel(x_ref, w1_ref, b1_ref, w2_ref, b2_ref,
                         wh_ref, bh_ref, out_ref, *, out_dim):
    # Cast the f32 state tile to the matmul dtype *inside* the kernel: state's
    # HBM stream stays a single f32 read (no wrapper cast round trip).
    x = x_ref[...].astype(w1_ref.dtype)

    # shared_network: Linear(in,256) -> ReLU -> Linear(256,128) -> ReLU
    # (f32 accumulation, f32 bias/ReLU epilogue)
    h1 = jnp.dot(x, w1_ref[...], preferred_element_type=jnp.float32) + b1_ref[...]
    h1 = jnp.maximum(h1, 0.0).astype(w2_ref.dtype)
    h2 = jnp.dot(h1, w2_ref[...], preferred_element_type=jnp.float32) + b2_ref[...]
    h2 = jnp.maximum(h2, 0.0).astype(wh_ref.dtype)

    # Fused heads: columns [0, out_dim) = actor_mean, column out_dim = critic,
    # remaining columns are zero padding up to a 128-lane multiple.
    head = jnp.dot(h2, wh_ref[...], preferred_element_type=jnp.float32) + bh_ref[...]

    # tanh only on the actor-mean columns; critic / padding pass through.
    lane = lax.broadcasted_iota(jnp.int32, head.shape, 1)
    out_ref[...] = jnp.where(lane < out_dim, jnp.tanh(head), head).astype(out_ref.dtype)


# ---------------------------------------------------------------------------
# One-time parameter preparation (run OUTSIDE the per-call forward path)
# ---------------------------------------------------------------------------
def prepare_params(params, *, compute_dtype=jnp.float32):
    """Fuse actor/critic heads, cast weights once, precompute action_std.

    Returns a tuple of arrays consumed by ship_actor_critic_forward plus the
    (static) output dimension.
    """
    w1, b1, w2, b2, wm, bm, wc, bc, log_std = params
    hidden = w2.shape[1]                       # 128
    out_dim = wm.shape[1]

    head_pad = _round_up(out_dim + 1, 128)
    wh = jnp.zeros((hidden, head_pad), jnp.float32)
    wh = wh.at[:, :out_dim].set(wm).at[:, out_dim:out_dim + 1].set(wc)
    bh = jnp.zeros((1, head_pad), jnp.float32)
    bh = bh.at[:, :out_dim].set(bm.reshape(1, -1))
    bh = bh.at[:, out_dim:out_dim + 1].set(bc.reshape(1, 1))

    # action_std = exp(clamp(log_std, -20, 2)) is batch-independent.
    action_std = jnp.exp(jnp.clip(log_std, -20.0, 2.0))

    # Note: on the bf16 path the critic column is also quantized to bf16; keep
    # compute_dtype=f32 if value-function precision is critical (head matmul
    # cost is negligible either way).
    arrays = (w1.astype(compute_dtype), b1.astype(jnp.float32),
              w2.astype(compute_dtype), b2.astype(jnp.float32),
              wh.astype(compute_dtype), bh.astype(jnp.float32),
              action_std)
    return arrays, out_dim


# ---------------------------------------------------------------------------
# Forward
# ---------------------------------------------------------------------------
def ship_actor_critic_forward(state, prepped, *, out_dim,
                              tile_b=None, out_dtype=jnp.float32):
    """state: (B, input_dim) f32; prepped from prepare_params().

    Returns (action_mean (B,out), action_std (out,), state_value (B,1)).
    """
    w1, b1, w2, b2, wh, bh, action_std = prepped
    B, input_dim = state.shape
    hidden1 = w1.shape[1]                      # 256
    hidden2 = w2.shape[1]                      # 128
    head_pad = wh.shape[1]

    cbytes = jnp.dtype(w1.dtype).itemsize      # MXU operand bytes
    obytes = jnp.dtype(out_dtype).itemsize
    # Sub-32-bit operands pack rows along sublanes -> align tile rows to 16/32.
    row_align = 8 if cbytes >= 4 else (16 if cbytes == 2 else 32)

    # ---- batch tile selection --------------------------------------------
    if tile_b is None:
        tile_b = 2048
    tb = max(row_align, _round_up(tile_b, row_align))
    Bp_rows = _round_up(B, row_align)
    if Bp_rows <= tb:
        if Bp_rows >= 1024:
            # Large batch in one tile: split into >=2 steps so the pipeline
            # overlaps DMA/compute and v7x can use both TensorCores.
            tb = max(row_align, _round_up((Bp_rows + 1) // 2, row_align))
        else:
            tb = Bp_rows

    # ---- cap the tile against a per-step VMEM budget ----------------------
    lane_in = _round_up(input_dim, 128)        # x block is lane-padded in VMEM
    per_row = (2 * lane_in * 4                           # x, double-buffered (f32)
               + 2 * head_pad * obytes                   # out, double-buffered
               + (hidden1 + hidden2 + head_pad) * 4      # f32 temporaries
               + (lane_in + hidden1 + hidden2) * cbytes) # compute-dtype casts
    budget = 20 * 1024 * 1024
    tb = min(tb, max(row_align, (budget // per_row) // row_align * row_align))

    Bp = _round_up(B, tb)
    if Bp != B:
        state = jnp.pad(state, ((0, Bp - B), (0, 0)))
    grid = (Bp // tb,)

    # ---- specs -------------------------------------------------------------
    def full2(arr):
        return pl.BlockSpec(arr.shape, lambda i: (0, 0))

    in_specs = [
        pl.BlockSpec((tb, input_dim), lambda i: (i, 0)),   # x (batch-tiled)
        full2(w1), full2(b1),
        full2(w2), full2(b2),
        full2(wh), full2(bh),
    ]
    out_specs = pl.BlockSpec((tb, head_pad), lambda i: (i, 0))
    out_shape = jax.ShapeDtypeStruct((Bp, head_pad), out_dtype)

    # ---- cost estimate & compiler params -----------------------------------
    weight_bytes = ((input_dim * hidden1 + hidden1 * hidden2 + hidden2 * head_pad)
                    * cbytes
                    + (hidden1 + hidden2 + head_pad) * 4)
    cost = pl.CostEstimate(
        flops=2 * Bp * (input_dim * hidden1 + hidden1 * hidden2 + hidden2 * head_pad),
        transcendentals=Bp * head_pad,
        bytes_accessed=Bp * input_dim * 4 + Bp * head_pad * obytes + weight_bytes,
    )
    vmem_needed = int(1.5 * (tb * per_row + 2 * weight_bytes))
    vmem_limit = int(min(max(vmem_needed, 32 * 1024 * 1024), 48 * 1024 * 1024))

    slab = pl.pallas_call(
        functools.partial(_actor_critic_kernel, out_dim=out_dim),
        grid=grid,
        in_specs=in_specs,
        out_specs=out_specs,
        out_shape=out_shape,
        cost_estimate=cost,
        compiler_params=pltpu.CompilerParams(
            dimension_semantics=("parallel",),     # no cross-step carry
            vmem_limit_bytes=vmem_limit),
    )(state, w1, b1, w2, b2, wh, bh)

    action_mean = slab[:B, :out_dim]
    state_value = slab[:B, out_dim:out_dim + 1]
    return action_mean, action_std, state_value


# ---------------------------------------------------------------------------
# Param init + reference
# ---------------------------------------------------------------------------
def init_params(key, input_dim, output_dim):
    """Mimics nn.Linear's U(-1/sqrt(fan_in), 1/sqrt(fan_in)).
    Weights stored as (in, out); biases as (1, out)."""
    def linear(k, fan_in, fan_out):
        kw, kb = jax.random.split(k)
        bound = 1.0 / np.sqrt(fan_in)
        w = jax.random.uniform(kw, (fan_in, fan_out), jnp.float32, -bound, bound)
        b = jax.random.uniform(kb, (1, fan_out), jnp.float32, -bound, bound)
        return w, b

    k1, k2, k3, k4 = jax.random.split(key, 4)
    w1, b1 = linear(k1, input_dim, 256)
    w2, b2 = linear(k2, 256, 128)
    wm, bm = linear(k3, 128, output_dim)
    wc, bc = linear(k4, 128, 1)
    log_std = jnp.zeros((output_dim,), jnp.float32)   # nn.Parameter(torch.zeros(out))
    return (w1, b1, w2, b2, wm, bm, wc, bc, log_std)


def _reference_forward(state, params):
    w1, b1, w2, b2, wm, bm, wc, bc, log_std = params
    h = jnp.maximum(state @ w1 + b1, 0.0)
    h = jnp.maximum(h @ w2 + b2, 0.0)
    mean = jnp.tanh(h @ wm + bm)
    std = jnp.exp(jnp.clip(log_std, -20.0, 2.0))
    value = h @ wc + bc
    return mean, std, value


# ---------------------------------------------------------------------------
# Tests
# ---------------------------------------------------------------------------
if __name__ == "__main__":
    B, INPUT_DIM, OUTPUT_DIM = 16, 32, 8

    key = jax.random.PRNGKey(0)
    k_params, k_state, k_big = jax.random.split(key, 3)
    params = init_params(k_params, INPUT_DIM, OUTPUT_DIM)
    state = jax.random.normal(k_state, (B, INPUT_DIM), jnp.float32)

    # --- f32 path (exact check) ---
    prepped_f32, out_dim = prepare_params(params)          # one-time prep
    fwd = jax.jit(functools.partial(ship_actor_critic_forward, out_dim=out_dim))
    action_mean, action_std, state_value = jax.block_until_ready(
        fwd(state, prepped_f32))

    ref_mean, ref_std, ref_value = _reference_forward(state, params)
    np.testing.assert_allclose(np.asarray(action_mean), np.asarray(ref_mean),
                               rtol=1e-5, atol=1e-5)
    np.testing.assert_allclose(np.asarray(action_std), np.asarray(ref_std),
                               rtol=1e-5, atol=1e-5)
    np.testing.assert_allclose(np.asarray(state_value), np.asarray(ref_value),
                               rtol=1e-5, atol=1e-5)
    assert action_mean.shape == (B, OUTPUT_DIM)
    assert action_std.shape == (OUTPUT_DIM,)
    assert state_value.shape == (B, 1)

    # --- non-multiple batch (padding path) ---
    state_odd = state[:13]
    m_odd, s_odd, v_odd = jax.block_until_ready(fwd(state_odd, prepped_f32))
    rm, rs, rv = _reference_forward(state_odd, params)
    np.testing.assert_allclose(np.asarray(m_odd), np.asarray(rm), rtol=1e-5, atol=1e-5)
    np.testing.assert_allclose(np.asarray(v_odd), np.asarray(rv), rtol=1e-5, atol=1e-5)
    assert m_odd.shape == (13, OUTPUT_DIM) and v_odd.shape == (13, 1)

    # --- larger batch: exercises the >=2-step grid / auto tile split ---
    state_big = jax.random.normal(k_big, (1536, INPUT_DIM), jnp.float32)
    m_big, s_big, v_big = jax.block_until_ready(fwd(state_big, prepped_f32))
    rmb, rsb, rvb = _reference_forward(state_big, params)
    np.testing.assert_allclose(np.asarray(m_big), np.asarray(rmb), rtol=1e-4, atol=1e-4)
    np.testing.assert_allclose(np.asarray(v_big), np.asarray(rvb), rtol=1e-4, atol=1e-4)
    assert m_big.shape == (1536, OUTPUT_DIM) and v_big.shape == (1536, 1)

    # --- bf16 MXU path (in-kernel state cast, bf16 output slab; looser tol) ---
    prepped_bf16, _ = prepare_params(params, compute_dtype=jnp.bfloat16)
    fwd_bf16 = jax.jit(functools.partial(ship_actor_critic_forward,
                                         out_dim=out_dim,
                                         out_dtype=jnp.bfloat16))
    m_bf, s_bf, v_bf = jax.block_until_ready(fwd_bf16(state, prepped_bf16))
    np.testing.assert_allclose(np.asarray(m_bf, dtype=np.float32),
                               np.asarray(ref_mean), rtol=5e-2, atol=5e-2)
    np.testing.assert_allclose(np.asarray(v_bf, dtype=np.float32),
                               np.asarray(ref_value), rtol=5e-2, atol=5e-2)

    # TODO(synk): sample_action (torch.distributions.Normal rsample/log_prob) is
    # RNG-based policy sampling, not part of the forward pass; not implemented here.
    print("KERNEL_OK")
</pallas_src>

<mosaic_0001>
module attributes {stable_mosaic.version = 11 : i64} {
  func.func @_actor_critic_kernel(%arg0: i32, %arg1: memref<16x32xf32, #tpu.memory_space<vmem>>, %arg2: memref<32x256xf32, #tpu.memory_space<vmem>>, %arg3: memref<1x256xf32, #tpu.memory_space<vmem>>, %arg4: memref<256x128xf32, #tpu.memory_space<vmem>>, %arg5: memref<1x128xf32, #tpu.memory_space<vmem>>, %arg6: memref<128x128xf32, #tpu.memory_space<vmem>>, %arg7: memref<1x128xf32, #tpu.memory_space<vmem>>, %arg8: memref<16x128xf32, #tpu.memory_space<vmem>>) attributes {dimension_semantics = [#tpu.dimension_semantics<parallel>], iteration_bounds = array<i64: 1>, scalar_prefetch = 0 : i64, scratch_operands = 0 : i64, tpu.core_type = #tpu.core_type<tc>, window_params = [{transform_indices = @transform_0, window_bounds = array<i64: 16, 32>}, {pipeline_mode = #tpu.pipeline_mode<synchronous>, transform_indices = @transform_1, window_bounds = array<i64: 32, 256>}, {pipeline_mode = #tpu.pipeline_mode<synchronous>, transform_indices = @transform_2, window_bounds = array<i64: 1, 256>}, {pipeline_mode = #tpu.pipeline_mode<synchronous>, transform_indices = @transform_3, window_bounds = array<i64: 256, 128>}, {pipeline_mode = #tpu.pipeline_mode<synchronous>, transform_indices = @transform_4, window_bounds = array<i64: 1, 128>}, {pipeline_mode = #tpu.pipeline_mode<synchronous>, transform_indices = @transform_5, window_bounds = array<i64: 128, 128>}, {pipeline_mode = #tpu.pipeline_mode<synchronous>, transform_indices = @transform_6, window_bounds = array<i64: 1, 128>}, {transform_indices = @transform_7, window_bounds = array<i64: 16, 128>}]} {
    %c0 = arith.constant 0 : index
    %c0_0 = arith.constant 0 : index
    %0 = vector.load %arg1[%c0, %c0_0] : memref<16x32xf32, #tpu.memory_space<vmem>>, vector<16x32xf32>
    %c0_1 = arith.constant 0 : index
    %c0_2 = arith.constant 0 : index
    %1 = vector.load %arg2[%c0_1, %c0_2] : memref<32x256xf32, #tpu.memory_space<vmem>>, vector<32x256xf32>
    %cst = arith.constant dense<0.000000e+00> : vector<16x256xf32>
    %2 = tpu.matmul %0, %1, %cst {dimension_numbers = #tpu.dot_dimension_numbers<[1], [0], [0], [1], [0, 0, 1, 1], [], []>} : vector<16x32xf32>, vector<32x256xf32>, vector<16x256xf32> -> vector<16x256xf32>
    %c0_3 = arith.constant 0 : index
    %c0_4 = arith.constant 0 : index
    %3 = vector.load %arg3[%c0_3, %c0_4] : memref<1x256xf32, #tpu.memory_space<vmem>>, vector<1x256xf32>
    %4 = vector.broadcast %3 : vector<1x256xf32> to vector<16x256xf32>
    %5 = arith.addf %2, %4 : vector<16x256xf32>
    %cst_5 = arith.constant 0.000000e+00 : f32
    %6 = vector.broadcast %cst_5 : f32 to vector<16x256xf32>
    %7 = arith.maximumf %5, %6 : vector<16x256xf32>
    %c0_6 = arith.constant 0 : index
    %c0_7 = arith.constant 0 : index
    %8 = vector.load %arg4[%c0_6, %c0_7] : memref<256x128xf32, #tpu.memory_space<vmem>>, vector<256x128xf32>
    %cst_8 = arith.constant dense<0.000000e+00> : vector<16x128xf32>
    %9 = tpu.matmul %7, %8, %cst_8 {dimension_numbers = #tpu.dot_dimension_numbers<[1], [0], [0], [1], [0, 0, 1, 1], [], []>} : vector<16x256xf32>, vector<256x128xf32>, vector<16x128xf32> -> vector<16x128xf32>
    %c0_9 = arith.constant 0 : index
    %c0_10 = arith.constant 0 : index
    %10 = vector.load %arg5[%c0_9, %c0_10] : memref<1x128xf32, #tpu.memory_space<vmem>>, vector<1x128xf32>
    %11 = vector.broadcast %10 : vector<1x128xf32> to vector<16x128xf32>
    %12 = arith.addf %9, %11 : vector<16x128xf32>
    %cst_11 = arith.constant 0.000000e+00 : f32
    %13 = vector.broadcast %cst_11 : f32 to vector<16x128xf32>
    %14 = arith.maximumf %12, %13 : vector<16x128xf32>
    %c0_12 = arith.constant 0 : index
    %c0_13 = arith.constant 0 : index
    %15 = vector.load %arg6[%c0_12, %c0_13] : memref<128x128xf32, #tpu.memory_space<vmem>>, vector<128x128xf32>
    %cst_14 = arith.constant dense<0.000000e+00> : vector<16x128xf32>
    %16 = tpu.matmul %14, %15, %cst_14 {dimension_numbers = #tpu.dot_dimension_numbers<[1], [0], [0], [1], [0, 0, 1, 1], [], []>} : vector<16x128xf32>, vector<128x128xf32>, vector<16x128xf32> -> vector<16x128xf32>
    %c0_15 = arith.constant 0 : index
    %c0_16 = arith.constant 0 : index
    %17 = vector.load %arg7[%c0_15, %c0_16] : memref<1x128xf32, #tpu.memory_space<vmem>>, vector<1x128xf32>
    %18 = vector.broadcast %17 : vector<1x128xf32> to vector<16x128xf32>
    %19 = arith.addf %16, %18 : vector<16x128xf32>
    %20 = tpu.iota {dimensions = array<i32: 1>} : vector<16x128xi32>
    %c8_i32 = arith.constant 8 : i32
    %21 = vector.broadcast %c8_i32 : i32 to vector<16x128xi32>
    %22 = arith.cmpi slt, %20, %21 : vector<16x128xi32>
    %23 = math.tanh %19 : vector<16x128xf32>
    %24 = arith.select %22, %23, %19 : vector<16x128xi1>, vector<16x128xf32>
    %c0_17 = arith.constant 0 : index
    %c0_18 = arith.constant 0 : index
    %25 = vector.load %arg8[%c0_17, %c0_18] : memref<16x128xf32, #tpu.memory_space<vmem>>, vector<16x128xf32>
    tpu.vector_store %arg8[%c0_17, %c0_18], %24 {strides = array<i32>} : memref<16x128xf32, #tpu.memory_space<vmem>>, vector<16x128xf32>,
    return
  }
  func.func @transform_0(%arg0: i32) -> (i32, i32) {
    %c0_i32 = arith.constant 0 : i32
    %c0_i32_0 = arith.constant 0 : i32
    return %arg0, %c0_i32 : i32, i32
  }
  func.func @transform_1(%arg0: i32) -> (i32, i32) {
    %c0_i32 = arith.constant 0 : i32
    %c0_i32_0 = arith.constant 0 : i32
    %c0_i32_1 = arith.constant 0 : i32
    return %c0_i32, %c0_i32_0 : i32, i32
  }
  func.func @transform_2(%arg0: i32) -> (i32, i32) {
    %c0_i32 = arith.constant 0 : i32
    %c0_i32_0 = arith.constant 0 : i32
    %c0_i32_1 = arith.constant 0 : i32
    return %c0_i32, %c0_i32_0 : i32, i32
  }
  func.func @transform_3(%arg0: i32) -> (i32, i32) {
    %c0_i32 = arith.constant 0 : i32
    %c0_i32_0 = arith.constant 0 : i32
    %c0_i32_1 = arith.constant 0 : i32
    return %c0_i32, %c0_i32_0 : i32, i32
  }
  func.func @transform_4(%arg0: i32) -> (i32, i32) {
    %c0_i32 = arith.constant 0 : i32
    %c0_i32_0 = arith.constant 0 : i32
    %c0_i32_1 = arith.constant 0 : i32
    return %c0_i32, %c0_i32_0 : i32, i32
  }
  func.func @transform_5(%arg0: i32) -> (i32, i32) {
    %c0_i32 = arith.constant 0 : i32
    %c0_i32_0 = arith.constant 0 : i32
    %c0_i32_1 = arith.constant 0 : i32
    return %c0_i32, %c0_i32_0 : i32, i32
  }
  func.func @transform_6(%arg0: i32) -> (i32, i32) {
    %c0_i32 = arith.constant 0 : i32
    %c0_i32_0 = arith.constant 0 : i32
    %c0_i32_1 = arith.constant 0 : i32
    return %c0_i32, %c0_i32_0 : i32, i32
  }
  func.func @transform_7(%arg0: i32) -> (i32, i32) {
    %c0_i32 = arith.constant 0 : i32
    %c0_i32_0 = arith.constant 0 : i32
    return %arg0, %c0_i32 : i32, i32
  }
}

</mosaic_0001>

<bundles_post_ra>
// kernel: ship_actor_critic_forward.1
= control target key start
LH: loop header
LB: loop body
LE: loop exit
PB: predicated region body
PF: predicated region fallthrough
CT: control target
= control target key end

     0   :  { %12 = vsyncpa [#allocation3], 0  ;;  %s825_s0 = inlined_call_operand.hbm [shape: f32[16,32], index: 0, kind: input, shape index: {}]   ;;  %s826_s1 = inlined_call_operand.hbm [shape: f32[32,256], index: 1, kind: input, shape index: {}]   ;;  %s827_s2 = inlined_call_operand.vmem [shape: f32[1,256], index: 2, kind: input, shape index: {}]   ;;  %s828_s3 = inlined_call_operand.hbm [shape: f32[256,128], index: 3, kind: input, shape index: {}]   ;;  %s829_s4 = inlined_call_operand.vmem [shape: f32[1,128], index: 4, kind: input, shape index: {}]   ;;  %s830_s5 = inlined_call_operand.hbm [shape: f32[128,128], index: 5, kind: input, shape index: {}]   ;;  %s831_s6 = inlined_call_operand.vmem [shape: f32[1,128], index: 6, kind: input, shape index: {}]   ;;  %s832_s7 = inlined_call_operand.vmem [shape: f32[16,128], index: 7, kind: output, shape index: {}]  }
   0x1   :  { %13 = vsyncpa [#allocation5], 0 }
   0x2   :  { %14 = vsyncpa [#allocation8], 0  ;;  %s695_s24 = smov [#allocation4]   ;;  %s601_s28 = scalar_lea.hbm %s826_s1, 1024 }
   0x3   :  { %s32_s25 = sshll.u32 %s695_s24, 4  ;;  %p602_p0 = scmp.ne.s32.totalorder %s826_s1, %s601_s28  ;;  %s33_s25 = int_to_ptr.vmem [resolvable:$true] %s32_s25 }
   0x4   :  { %p605_p1 = scmp.lt.u32.totalorder %s601_s28, %s826_s1 }
   0x6   :  { %p607_p2 = pnand %p605_p1, %p602_p0 }
   0x8   :  { %610 = shalt.err (!%p607_p2)
}
   0x9   :  { %s611_s10 = scalar_lea.vmem %s33_s25, 1024  ;;  %p616_p4 = scmp.lt.s32.totalorder %s33_s25, %s33_s25 }
   0xa   :  { %p612_p3 = scmp.ne.s32.totalorder %s33_s25, %s611_s10  ;;  %p617_p5 = scmp.lt.s32.totalorder %s611_s10, %s611_s10 }
   0xc   :  { %p618_p6 = por %p617_p5, %p616_p4 }
   0xe   :  { %p619_p7 = pnand %p618_p6, %p612_p3 }
  0x10   :  { %622 = shalt.err (!%p619_p7)
}
  0x11   :  { %s696_s11 = smov 256   ;;  %s697_s12 = smov 16  }
  0x12   :  { %38 = dma.hbm_to_vmem [thread:$0]  %s826_s1, 1024, %s33_s25, [#allocation5], %s696_s11, %s696_s11, %s697_s12  }
  0x13   :  { %s698_s15 = smov [#allocation2]   ;;  %s623_s19 = scalar_lea.hbm %s825_s0, 256 }
  0x14   :  { %s20_s16 = sshll.u32 %s698_s15, 4  ;;  %p624_p8 = scmp.ne.s32.totalorder %s825_s0, %s623_s19  ;;  %s21_s16 = int_to_ptr.vmem [resolvable:$true] %s20_s16 }
  0x15   :  { %p627_p9 = scmp.lt.u32.totalorder %s623_s19, %s825_s0 }
  0x17   :  { %p629_p10 = pnand %p627_p9, %p624_p8 }
  0x19   :  { %632 = shalt.err (!%p629_p10)
}
  0x1a   :  { %s633_s24 = scalar_lea.vmem %s21_s16, 256  ;;  %p638_p12 = scmp.lt.s32.totalorder %s21_s16, %s21_s16 }
  0x1b   :  { %p634_p11 = scmp.ne.s32.totalorder %s21_s16, %s633_s24  ;;  %p639_p13 = scmp.lt.s32.totalorder %s633_s24, %s633_s24 }
  0x1d   :  { %p640_p0 = por %p639_p13, %p638_p12 }
  0x1f   :  { %p641_p1 = pnand %p640_p0, %p634_p11 }
  0x21   :  { %644 = shalt.err (!%p641_p1)
}
  0x22   :  { %s699_s1 = smov 128   ;;  %s700_s25 = smov 8  }
  0x23   :  { %26 = dma.hbm_to_vmem [thread:$0]  %s825_s0, 256, %s21_s16, [#allocation3], %s699_s1, %s699_s1, %s700_s25  }
  0x24   :  { %s701_s28 = smov [#allocation6]   ;;  %s702_s30 = smov [#allocation7]  }
  0x25   :  { %s46_s29 = sshll.u32 %s701_s28, 4  ;;  %s60_s8 = sshll.u32 %s702_s30, 4  ;;  %s47_s29 = int_to_ptr.vmem [resolvable:$true] %s46_s29  ;;  %s771_s8 = int_to_ptr.vmem [resolvable:$true] %s60_s8 }
  0x26   :  { %s645_s11 = scalar_lea.hbm %s828_s3, 4096 }
  0x27   :  { %p646_p2 = scmp.ne.s32.totalorder %s828_s3, %s645_s11  ;;  %p649_p3 = scmp.lt.u32.totalorder %s645_s11, %s828_s3 }
  0x29   :  { %p651_p4 = pnand %p649_p3, %p646_p2 }
  0x2b   :  { %654 = shalt.err (!%p651_p4)
}
  0x2c   :  { %s655_s0 = scalar_lea.vmem %s47_s29, 4096  ;;  %p660_p6 = scmp.lt.s32.totalorder %s47_s29, %s47_s29 }
  0x2d   :  { %p656_p5 = scmp.ne.s32.totalorder %s47_s29, %s655_s0  ;;  %p661_p7 = scmp.lt.s32.totalorder %s655_s0, %s655_s0 }
  0x2f   :  { %p662_p8 = por %p661_p7, %p660_p6 }
  0x31   :  { %p663_p9 = pnand %p662_p8, %p656_p5 }
  0x33   :  { %666 = shalt.err (!%p663_p9)
}
  0x34   :  { %52 = dma.hbm_to_vmem [thread:$0]  %s828_s3, 4096, %s47_s29, [#allocation5], %s699_s1, %s699_s1, %s700_s25  }
  0x35   :  { %s667_s20 = scalar_lea.hbm %s830_s5, 2048 }
  0x36   :  { %p668_p10 = scmp.ne.s32.totalorder %s830_s5, %s667_s20  ;;  %p671_p11 = scmp.lt.u32.totalorder %s667_s20, %s830_s5 }
  0x38   :  { %p673_p12 = pnand %p671_p11, %p668_p10 }
  0x3a   :  { %676 = shalt.err (!%p673_p12)
}
  0x3b   :  { %s677_s26 = scalar_lea.vmem %s771_s8, 2048  ;;  %p682_p0 = scmp.lt.s32.totalorder %s771_s8, %s771_s8 }
  0x3c   :  { %p678_p13 = scmp.ne.s32.totalorder %s771_s8, %s677_s26  ;;  %p683_p1 = scmp.lt.s32.totalorder %s677_s26, %s677_s26 }
  0x3e   :  { %p684_p2 = por %p683_p1, %p682_p0 }
  0x40   :  { %p685_p3 = pnand %p684_p2, %p678_p13 }
  0x42   :  { %688 = shalt.err (!%p685_p3)
}
  0x43   :  { %66 = dma.hbm_to_vmem [thread:$0]  %s830_s5, 2048, %s771_s8, [#allocation8], %s699_s1, %s699_s1, %s700_s25  }
  0x44   :  { %689 = dma.done.wait [#allocation3], 256  }
  0x45   :  { %690 = vsyncadd [#allocation3], 4294967040 }
  0x46   :  { %691 = dma.done.wait [#allocation5], 5120  }
  0x47   :  { %692 = vsyncadd [#allocation5], 4294962176 }
  0x48   :  { %693 = dma.done.wait [#allocation8], 2048  }
  0x49   :  { %694 = vsyncadd [#allocation8], 4294965248  ;;  %v703_v0 = vmov 0.0   ;;  %v84_v1 = vld [vmem:[#allocation4 + $0x8] sm:$0xff]  ;;  %v86_v2 = vld [vmem:[#allocation4 + $0x18] sm:$0xff]  ;;  %vm103_vm0 = vcmask 261120  }
  0x4a   :  { %174 = vmatprep.mubr.f32.mxu0 %v703_v0  ;;  %v83_v3 = vld [vmem:[#allocation4] sm:$0xff]  ;;  %v516_v4 = vpack.c.bf16 %v86_v2, %v84_v1  ;;  %v85_v5 = vld [vmem:[#allocation4 + $0x10] sm:$0xff]  ;;  %v88_v6 = vld [vmem:[#allocation4 + $0x28] sm:$0xff] }
  0x4b   :  { %v90_v7 = vld [vmem:[#allocation4 + $0x38] sm:$0xff]  ;;  %v518_v8 = vpack.c.bf16 %v85_v5, %v83_v3  ;;  %v87_v10 = vld [vmem:[#allocation4 + $0x20] sm:$0xff]  ;;  %v89_v11 = vld [vmem:[#allocation4 + $0x30] sm:$0xff] }
  0x4c   :  { %v520_v9 = vpack.c.bf16 %v90_v7, %v88_v6  ;;  %517 = vmatprep.subr.bf16.mxu0 %v516_v4  ;;  %v207_v12 = vld [vmem:[#allocation6 + $0x80] sm:$0xff]  ;;  %v208_v13 = vld [vmem:[#allocation6 + $0x88] sm:$0xff]  ;;  %v522_v14 = vpack.c.bf16 %v89_v11, %v87_v10  ;;  %v209_v18 = vld [vmem:[#allocation6 + $0x90] sm:$0xff] }
  0x4d   :  { %519 = vmatpush1.bf16.msra.mxu0 %v518_v8  ;;  %v524_v15 = vpack.c.bf16 %v208_v13, %v207_v12  ;;  %v191_v16 = vld [vmem:[#allocation6] sm:$0xff]  ;;  %v192_v17 = vld [vmem:[#allocation6 + $0x8] sm:$0xff]  ;;  %v210_v20 = vld [vmem:[#allocation6 + $0x98] sm:$0xff] }
  0x4e   :  { %521 = vmatprep.subr.bf16.mxu0 %v520_v9  ;;  %v526_v19 = vpack.c.bf16 %v192_v17, %v191_v16  ;;  %v193_v21 = vld [vmem:[#allocation6 + $0x10] sm:$0xff]  ;;  %v194_v22 = vld [vmem:[#allocation6 + $0x18] sm:$0xff]  ;;  %v528_v23 = vpack.c.bf16 %v210_v20, %v209_v18  ;;  %v211_v24 = vld [vmem:[#allocation6 + $0xa0] sm:$0xff] }
  0x4f   :  { %525 = vmatprep.subr.bf16.mxu1 %v524_v15  ;;  %v212_v25 = vld [vmem:[#allocation6 + $0xa8] sm:$0xff]  ;;  %v530_v26 = vpack.c.bf16 %v194_v22, %v193_v21  ;;  %v81_v27 = vld [vmem:[#allocation2] sm:$0xff]  ;;  %v195_v29 = vld [vmem:[#allocation6 + $0x20] sm:$0xff] }
  0x50   :  { %527 = vmatpush3.bf16.msra.mxu1 %v526_v19  ;;  %v532_v28 = vpack.c.bf16 %v212_v25, %v211_v24  ;;  %v196_v30 = vld [vmem:[#allocation6 + $0x28] sm:$0xff]  ;;  %v213_v31 = vld [vmem:[#allocation6 + $0xb0] sm:$0xff]  ;;  %v214_v32 = vld [vmem:[#allocation6 + $0xb8] sm:$0xff] }
  0x51   :  { %523 = vmatpush1.bf16.msra.mxu0 %v522_v14  ;;  %529 = vmatprep.subr.bf16.mxu1 %v528_v23  ;;  %v534_v33 = vpack.c.bf16 %v196_v30, %v195_v29  ;;  %v82_v34 = vld [vmem:[#allocation2 + $0x8] sm:$0xff]  ;;  %v536_v35 = vpack.c.bf16 %v214_v32, %v213_v31  ;;  %v197_v36 = vld [vmem:[#allocation6 + $0x30] sm:$0xff]  ;;  %v215_v38 = vld [vmem:[#allocation6 + $0xc0] sm:$0xff]  ;;  %v93_v14 = vlaneseq }
  0x52   :  { %v198_v37 = vld [vmem:[#allocation6 + $0x38] sm:$0xff]  ;;  %v216_v39 = vld [vmem:[#allocation6 + $0xc8] sm:$0xff]  ;;  %v199_v42 = vld [vmem:[#allocation6 + $0x40] sm:$0xff] }
  0x53   :  { %v538_v40 = vpack.c.bf16 %v198_v37, %v197_v36  ;;  %v540_v41 = vpack.c.bf16 %v216_v39, %v215_v38  ;;  %v200_v43 = vld [vmem:[#allocation6 + $0x48] sm:$0xff]  ;;  %v217_v44 = vld [vmem:[#allocation6 + $0xd0] sm:$0xff]  ;;  %v218_v45 = vld [vmem:[#allocation6 + $0xd8] sm:$0xff]  ;;  %v94_v15 = vshrl.u32 %v93_v14, 7 }
  0x54   :  { %421 = vmatmul.mubr.msk.f32.vlgmr.msra.gmra.mrb[0].mxu0 %vm103_vm0, %v81_v27  ;;  %531 = vmatpush3.bf16.msra.mxu1 %v530_v26  ;;  %v542_v46 = vpack.c.bf16 %v200_v43, %v199_v42  ;;  %v544_v47 = vpack.c.bf16 %v218_v45, %v217_v44  ;;  %v201_v48 = vld [vmem:[#allocation6 + $0x50] sm:$0xff]  ;;  %v202_v49 = vld [vmem:[#allocation6 + $0x58] sm:$0xff]  ;;  %v219_v50 = vld [vmem:[#allocation6 + $0xe0] sm:$0xff] }
  0x55   :  { %180 = vmatprep.mubr.f32.mxu0 %v703_v0  ;;  %533 = vmatprep.subr.bf16.mxu1 %v532_v28  ;;  %v220_v51 = vld [vmem:[#allocation6 + $0xe8] sm:$0xff]  ;;  %v546_v52 = vpack.c.bf16 %v202_v49, %v201_v48  ;;  %v203_v54 = vld [vmem:[#allocation6 + $0x60] sm:$0xff]  ;;  %v221_v57 = vld [vmem:[#allocation6 + $0xf0] sm:$0xff]  ;;  %v95_v16 = vsub.s32 0, %v94_v15  ;;  %v99_v18 = vsub.s32 1, %v94_v15 }
  0x56   :  { %v548_v53 = vpack.c.bf16 %v220_v51, %v219_v50  ;;  %v204_v55 = vld [vmem:[#allocation6 + $0x68] sm:$0xff]  ;;  %v222_v58 = vld [vmem:[#allocation6 + $0xf8] sm:$0xff]  ;;  %v205_v60 = vld [vmem:[#allocation6 + $0x70] sm:$0xff] }
  0x57   :  { %v550_v56 = vpack.c.bf16 %v204_v55, %v203_v54  ;;  %v552_v59 = vpack.c.bf16 %v222_v58, %v221_v57  ;;  %v206_v61 = vld [vmem:[#allocation6 + $0x78] sm:$0xff]  ;;  %v307_v63 = vld [vmem:[#allocation7] sm:$0xff]  ;;  %v308_v0 = vld [vmem:[#allocation7 + $0x8] sm:$0xff]  ;;  %v406_v58 = vand.u32 127, %v93_v14 }
  0x58   :  { %422 = vmatmul.mubr.msk.f32.gmra.mrb[2].mxu0 %vm103_vm0, %v82_v34  ;;  %535 = vmatpush3.bf16.msra.mxu1 %v534_v33  ;;  %v554_v62 = vpack.c.bf16 %v206_v61, %v205_v60  ;;  %v309_v1 = vld [vmem:[#allocation7 + $0x10] sm:$0xff]  ;;  %v556_v2 = vpack.c.bf16 %v308_v0, %v307_v63  ;;  %v310_v3 = vld [vmem:[#allocation7 + $0x18] sm:$0xff]  ;;  %v311_v5 = vld [vmem:[#allocation7 + $0x20] sm:$0xff] }
  0x59   :  { %537 = vmatprep.subr.bf16.mxu1 %v536_v35  ;;  %v560_v4 = vpack.c.bf16 %v310_v3, %v309_v1  ;;  %v312_v6 = vld [vmem:[#allocation7 + $0x28] sm:$0xff]  ;;  %v313_v8 = vld [vmem:[#allocation7 + $0x30] sm:$0xff]  ;;  %v314_v9 = vld [vmem:[#allocation7 + $0x38] sm:$0xff]  ;;  %vm407_vm1 = vcmp.lt.s32.totalorder %v406_v58, 8 }
  0x5a   :  { %557 = vmatprep.subr.bf16.mxu0 %v556_v2  ;;  %v564_v7 = vpack.c.bf16 %v312_v6, %v311_v5  ;;  %v568_v10 = vpack.c.bf16 %v314_v9, %v313_v8  ;;  %v315_v11 = vld [vmem:[#allocation7 + $0x40] sm:$0xff]  ;;  %v316_v12 = vld [vmem:[#allocation7 + $0x48] sm:$0xff]  ;;  %v91_v17 = vld [vmem:[%s827_s2] sm:$0x3] }
  0x5b   :  { %559 = vmatpush3.bf16.msra.mxu0 %v556_v2  ;;  %v572_v13 = vpack.c.bf16 %v316_v12, %v315_v11  ;;  %v96_v19 = vrot.slane %v91_v17, %v95_v16  ;;  %v100_v20 = vrot.slane %v91_v17, %v99_v18  ;;  %v317_v33 = vld [vmem:[#allocation7 + $0x50] sm:$0xff]  ;;  %v318_v34 = vld [vmem:[#allocation7 + $0x58] sm:$0xff]  ;;  %v319_v36 = vld [vmem:[#allocation7 + $0x60] sm:$0xff] }
  0x5c   :  { %539 = vmatpush3.bf16.msra.mxu1 %v538_v40  ;;  %561 = vmatprep.subr.bf16.mxu0 %v560_v4  ;;  %v576_v35 = vpack.c.bf16 %v318_v34, %v317_v33  ;;  %v320_v37 = vld [vmem:[#allocation7 + $0x68] sm:$0xff]  ;;  %v321_v39 = vld [vmem:[#allocation7 + $0x70] sm:$0xff]  ;;  %v322_v40 = vld [vmem:[#allocation7 + $0x78] sm:$0xff] }
  0x5d   :  { %541 = vmatprep.subr.bf16.mxu1 %v540_v41  ;;  %v580_v38 = vpack.c.bf16 %v320_v37, %v319_v36  ;;  %v584_v41 = vpack.c.bf16 %v322_v40, %v321_v39  ;;  %v423_v43 = vld [vmem:[%s829_s4] ss:$0 sm:$0xff] }
  0x5f   :  { %563 = vmatpush3.bf16.msra.mxu0 %v560_v4 }
  0x60   :  { %543 = vmatpush3.bf16.msra.mxu1 %v542_v46  ;;  %565 = vmatprep.subr.bf16.mxu0 %v564_v7 }
  0x61   :  { %545 = vmatprep.subr.bf16.mxu1 %v544_v47 }
  0x63   :  { %567 = vmatpush3.bf16.msra.mxu0 %v564_v7 }
  0x64   :  { %547 = vmatpush3.bf16.msra.mxu1 %v546_v52  ;;  %569 = vmatprep.subr.bf16.mxu0 %v568_v10 }
  0x65   :  { %549 = vmatprep.subr.bf16.mxu1 %v548_v53  ;;  %v424_v53 = vld [vmem:[%s831_s6] ss:$0 sm:$0xff] }
  0x67   :  { %571 = vmatpush3.bf16.msra.mxu0 %v568_v10 }
  0x68   :  { %551 = vmatpush3.bf16.msra.mxu1 %v550_v56  ;;  %573 = vmatprep.subr.bf16.mxu0 %v572_v13 }
  0x69   :  { %553 = vmatprep.subr.bf16.mxu1 %v552_v59 }
  0x6b   :  { %575 = vmatpush3.bf16.msra.mxu0 %v572_v13 }
  0x6c   :  { %555 = vmatpush3.bf16.msra.mxu1 %v554_v62  ;;  %577 = vmatprep.subr.bf16.mxu0 %v576_v35 }
  0x6f   :  { %579 = vmatpush3.bf16.msra.mxu0 %v576_v35 }
  0x70   :  { %581 = vmatprep.subr.bf16.mxu0 %v580_v38 }
  0x73   :  { %583 = vmatpush3.bf16.msra.mxu0 %v580_v38 }
  0x74   :  { %585 = vmatprep.subr.bf16.mxu0 %v584_v41 }
  0x77   :  { %587 = vmatpush3.bf16.msra.mxu0 %v584_v41 }
 0x127   :  { %v176_v21 = vpop.f32.mrb[0].mxu0 }
 0x128   :  { %v177_v22 = vadd.f32 %v176_v21, %v96_v19  ;;  %v178_v23 = vpop.f32.mrb[1].mxu0 }
 0x129   :  { %v179_v24 = vadd.f32 %v178_v23, %v100_v20 }
 0x12a   :  { %v187_v27 = vmax.f32 %v177_v22, 0.0 }
 0x12b   :  { %v182_v25 = vpop.f32.mrb[2].mxu0  ;;  %v188_v26 = vmax.f32 %v179_v24, 0.0 }
 0x12c   :  { %v183_v28 = vadd.f32 %v182_v25, %v96_v19  ;;  %v184_v29 = vpop.f32.mrb[3].mxu0 }
 0x12d   :  { %v185_v30 = vadd.f32 %v184_v29, %v100_v20  ;;  %294 = vmatprep.mubr.f32.mxu1 %v188_v26 }
 0x12e   :  { %295 = vmatmul.mubr.f32.vlgmr.msra.gmra.mrb[0].mxu1 %v187_v27  ;;  %v189_v32 = vmax.f32 %v183_v28, 0.0 }
 0x12f   :  { %v190_v31 = vmax.f32 %v185_v30, 0.0 }
 0x131   :  { %299 = vmatprep.mubr.f32.mxu1 %v190_v31 }
 0x132   :  { %300 = vmatmul.mubr.f32.gmra.mrb[2].mxu1 %v189_v32 }
 0x201   :  { %v457_v42 = vpop.f32.mrb[0].mxu1 }
 0x202   :  { %v458_v44 = vpop.f32.mrb[1].mxu1 }
 0x203   :  { %v459_v45 = vadd.f32 %v458_v44, %v457_v42 }
 0x205   :  { %v297_v46 = vadd.f32 %v459_v45, %v423_v43  ;;  %v460_v47 = vpop.f32.mrb[2].mxu1 }
 0x206   :  { %v461_v48 = vpop.f32.mrb[3].mxu1 }
 0x207   :  { %v305_v49 = vmax.f32 %v297_v46, 0.0  ;;  %v462_v50 = vadd.f32 %v461_v48, %v460_v47 }
 0x209   :  { %v302_v51 = vadd.f32 %v462_v50, %v423_v43  ;;  %513 = vmatprep.mubr.f32.mxu0 %v305_v49 }
 0x20b   :  { %v306_v52 = vmax.f32 %v302_v51, 0.0 }
 0x20d   :  { %514 = vmatmul.mubr.f32.vlgmr.msra.gmra.mrb[4].mxu0 %v306_v52 }
 0x2e0   :  { %v515_v54 = vpop.f32.mrb[4].mxu0 }
 0x2e1   :  { %v402_v55 = vadd.f32 %v515_v54, %v424_v53  ;;  %v396_v56 = vpop.f32.mrb[5].mxu0 }
 0x2e2   :  { %v397_v57 = vadd.f32 %v424_v53, %v396_v56 }
 0x2e3   :  { %597 = vtanh.f32 %v402_v55 }
 0x2e4   :  { %599 = vtanh.f32 %v397_v57 }
 0x2ed   :  { %v598_v59 = vpop.eup %597 }
 0x2ee   :  { %v600_v60 = vpop.eup %599  ;;  %v411_v61 = vsel %vm407_vm1, %v598_v59, %v402_v55 }
 0x2ef   :  { %413 = vst [vmem:[%s832_s7 + $0x8] sm:$0xff] %v411_v61  ;;  %v410_v62 = vsel %vm407_vm1, %v600_v60, %v397_v57 }
 0x2f0   :  { %412 = vst [vmem:[%s832_s7] sm:$0xff] %v410_v62 }
 0x2f1   :  { %418 = vsyncpa [#allocation3], 1 }
 0x2f2   :  { %419 = vsyncpa [#allocation5], 1 }
 0x2f3   :  { %420 = vsyncpa [#allocation8], 1 }

</bundles_post_ra>
